<compile_context>
chip_gen: v5e
topology: v5e:2x2
jax: 0.10.0
libtpu: 0.0.40
codegen_flags: <defaults>
</compile_context>

<pallas_src>
import functools

import jax
import jax.numpy as jnp
from jax.experimental import pallas as pl
from jax.experimental.pallas import tpu as pltpu


class Vocabulary:
    """Tiny stand-in for the original Vocabulary object."""

    def __init__(self, size: int, sos_token_id: int = 1):
        self._size = size
        self.sos_token_id = sos_token_id

    def __len__(self):
        return self._size


def _round_up(x: int, m: int) -> int:
    return ((x + m - 1) // m) * m


# --------------------------------------------------------------------------
# Kernel 1: sequential LSTM recurrence (only h @ W_hh^T per step).
# --------------------------------------------------------------------------
def _lstm_recurrence_kernel(gx_ref, h0_ref, c0_ref, whh_ref,
                            h_all_ref, hN_ref, cN_ref,
                            h_sc, c_sc, *, hidden_size):
    t = pl.program_id(0)

    @pl.when(t == 0)
    def _():
        h_sc[...] = h0_ref[...]
        c_sc[...] = c0_ref[...]

    h = h_sc[...]                       # (B, H) f32 carry
    c = c_sc[...]                       # (B, H) f32 carry

    # x-projection was hoisted; only the recurrent half of the gate matmul is here.
    gates = gx_ref[0] + jnp.dot(h.astype(jnp.bfloat16), whh_ref[...],
                                preferred_element_type=jnp.float32)   # (B, 4H) f32

    H = hidden_size                     # padded H -> slices land on lane boundaries
    i = jax.nn.sigmoid(gates[:, 0 * H:1 * H])
    f = jax.nn.sigmoid(gates[:, 1 * H:2 * H])
    g = jnp.tanh(gates[:, 2 * H:3 * H])
    o = jax.nn.sigmoid(gates[:, 3 * H:4 * H])

    c_new = f * c + i * g
    h_new = o * jnp.tanh(c_new)

    h_sc[...] = h_new
    c_sc[...] = c_new
    h_all_ref[0] = h_new.astype(h_all_ref.dtype)   # bf16 h_t for the parallel projection

    @pl.when(t == pl.num_programs(0) - 1)
    def _():
        hN_ref[...] = h_new
        cN_ref[...] = c_new


# --------------------------------------------------------------------------
# Kernel 2: parallel output projection + fused log_softmax, batch-first output.
# --------------------------------------------------------------------------
def _proj_logsoftmax_kernel(h_ref, wout_ref, bout_ref, out_ref):
    TT, B, H = h_ref.shape
    V = wout_ref.shape[1]

    h2 = h_ref[...].reshape(TT * B, H)                                  # bf16
    logits = jnp.dot(h2, wout_ref[...], preferred_element_type=jnp.float32)
    logits = logits.reshape(TT, B, V) + bout_ref[...]                   # (TT, B, V) f32

    m = jnp.max(logits, axis=-1, keepdims=True)
    shifted = logits - m
    logp = shifted - jnp.log(jnp.sum(jnp.exp(shifted), axis=-1, keepdims=True))

    # Write batch-first directly: lane-dense (B, V) slabs, no wrapper transpose pass.
    for tt in range(TT):
        out_ref[:, tt, :] = logp[tt]


class DecoderRNNPallas:
    """JAX/Pallas port of the PyTorch DecoderRNN forward pass."""

    def __init__(self, hidden_size: int, vocabulary: Vocabulary, key):
        self.hidden_size = hidden_size
        self.vocabulary = vocabulary
        V = len(vocabulary)
        H = hidden_size

        ks = jax.random.split(key, 8)
        scale = 0.1
        # f32 "module parameters" (same layout as PyTorch).
        self.embedding = scale * jax.random.normal(ks[0], (V, H), jnp.float32)
        self.w_ih = scale * jax.random.normal(ks[1], (4 * H, H), jnp.float32)
        self.w_hh = scale * jax.random.normal(ks[2], (4 * H, H), jnp.float32)
        self.b_ih = scale * jax.random.normal(ks[3], (4 * H,), jnp.float32)
        self.b_hh = scale * jax.random.normal(ks[4], (4 * H,), jnp.float32)
        self.w_out = scale * jax.random.normal(ks[5], (V, H), jnp.float32)
        self.b_out = scale * jax.random.normal(ks[6], (V,), jnp.float32)

        # ---- precompute padded / pre-transposed / bf16 kernel-side weights once ----
        H_p = _round_up(H, 128)
        V_p = _round_up(V, 128)
        self._H_p, self._V_p = H_p, V_p

        def pad_gate_weight(w):                       # (4H, H) -> (H_p, 4H_p), transposed
            w4 = w.reshape(4, H, H)
            w4 = jnp.pad(w4, ((0, 0), (0, H_p - H), (0, H_p - H)))
            return jnp.transpose(w4.reshape(4 * H_p, H_p))

        self.w_ih_t_p = pad_gate_weight(self.w_ih).astype(jnp.bfloat16)   # (H_p, 4H_p)
        self.w_hh_t_p = pad_gate_weight(self.w_hh).astype(jnp.bfloat16)   # (H_p, 4H_p)
        bias4 = (self.b_ih + self.b_hh).reshape(4, H)
        self.bias_p = jnp.pad(bias4, ((0, 0), (0, H_p - H))).reshape(4 * H_p)  # f32
        self.emb_p = jnp.pad(self.embedding, ((0, 0), (0, H_p - H)))           # (V, H_p)
        self.w_out_t_p = jnp.transpose(
            jnp.pad(self.w_out, ((0, V_p - V), (0, H_p - H)))).astype(jnp.bfloat16)  # (H_p, V_p)
        # Padded vocab entries get a huge negative bias so log_softmax ignores them.
        self.b_out_p = jnp.pad(self.b_out, (0, V_p - V),
                               constant_values=-1e30).reshape(1, V_p)          # f32

    # ---- Pallas call 1: sequential recurrence ----
    def _run_recurrence(self, gates_x, h0_p, c0_p):
        T, B_p, G_p = gates_x.shape
        H_p = self._H_p

        kernel = functools.partial(_lstm_recurrence_kernel, hidden_size=H_p)
        out_shapes = (
            jax.ShapeDtypeStruct((T, B_p, H_p), jnp.bfloat16),  # h_t for all steps
            jax.ShapeDtypeStruct((B_p, H_p), jnp.float32),      # h_T
            jax.ShapeDtypeStruct((B_p, H_p), jnp.float32),      # c_T
        )
        grid_spec = pltpu.PrefetchScalarGridSpec(
            num_scalar_prefetch=0,
            grid=(T,),
            in_specs=[
                pl.BlockSpec((1, B_p, G_p), lambda t: (t, 0, 0)),   # gates_x[t]
                pl.BlockSpec((B_p, H_p), lambda t: (0, 0)),         # h0
                pl.BlockSpec((B_p, H_p), lambda t: (0, 0)),         # c0
                pl.BlockSpec((H_p, G_p), lambda t: (0, 0)),         # W_hh^T (bf16)
            ],
            out_specs=[
                pl.BlockSpec((1, B_p, H_p), lambda t: (t, 0, 0)),
                pl.BlockSpec((B_p, H_p), lambda t: (0, 0)),
                pl.BlockSpec((B_p, H_p), lambda t: (0, 0)),
            ],
            scratch_shapes=[
                pltpu.VMEM((B_p, H_p), jnp.float32),  # h carry (f32)
                pltpu.VMEM((B_p, H_p), jnp.float32),  # c carry (f32)
            ],
        )
        return pl.pallas_call(
            kernel,
            out_shape=out_shapes,
            grid_spec=grid_spec,
            compiler_params=pltpu.CompilerParams(
                dimension_semantics=("arbitrary",)),   # true sequential recurrence
        )(gates_x, h0_p, c0_p, self.w_hh_t_p)

    # ---- Pallas call 2: parallel projection + log_softmax ----
    def _run_projection(self, h_all):
        T, B_p, H_p = h_all.shape
        V_p = self._V_p
        TT = 8 if T % 8 == 0 else T                    # time-tile (parallel grid axis)

        grid_spec = pltpu.PrefetchScalarGridSpec(
            num_scalar_prefetch=0,
            grid=(T // TT,),
            in_specs=[
                pl.BlockSpec((TT, B_p, H_p), lambda i: (i, 0, 0)),  # h tile (bf16)
                pl.BlockSpec((H_p, V_p), lambda i: (0, 0)),         # W_out^T (bf16)
                pl.BlockSpec((1, V_p), lambda i: (0, 0)),           # b_out (f32)
            ],
            out_specs=pl.BlockSpec((B_p, TT, V_p), lambda i: (0, i, 0)),
        )
        return pl.pallas_call(
            _proj_logsoftmax_kernel,
            out_shape=jax.ShapeDtypeStruct((B_p, T, V_p), jnp.float32),
            grid_spec=grid_spec,
            compiler_params=pltpu.CompilerParams(
                dimension_semantics=("parallel",)),    # shardable across TensorCores
        )(h_all, self.w_out_t_p, self.b_out_p)

    def forward(self, encoder_outputs, encoder_hidden, target_tensor,
                max_length=10):
        del max_length  # unused in the teacher-forcing path (as in the reference)
        B = encoder_outputs.shape[0]
        T = target_tensor.shape[1]
        V = len(self.vocabulary)
        H = self.hidden_size
        B_p = _round_up(B, 8)
        H_p, V_p = self._H_p, self._V_p

        # decoder_input = [SOS, target[:, :-1]]  (teacher forcing, shift-right)
        sos = jnp.full((B, 1), self.vocabulary.sos_token_id, dtype=jnp.int32)
        decoder_input = jnp.concatenate(
            [sos, target_tensor[:, :-1].astype(jnp.int32)], axis=1)          # (B, T)
        dec_in_p = jnp.pad(decoder_input, ((0, B_p - B), (0, 0)))            # (B_p, T)

        # Embedding gather directly in time-major order (no (B,T,H) transpose pass).
        x_tbh = jnp.take(self.emb_p, jnp.transpose(dec_in_p), axis=0)        # (T, B_p, H_p)

        # Hoisted input projection: one big bf16 MXU matmul over all T steps.
        gates_x = jnp.einsum(
            "tbh,hg->tbg", x_tbh.astype(jnp.bfloat16), self.w_ih_t_p,
            preferred_element_type=jnp.float32) + self.bias_p               # (T, B_p, 4H_p)

        h0, c0 = encoder_hidden                                             # each (1, B, H)
        h0_p = jnp.pad(h0[0].astype(jnp.float32), ((0, B_p - B), (0, H_p - H)))
        c0_p = jnp.pad(c0[0].astype(jnp.float32), ((0, B_p - B), (0, H_p - H)))

        h_all, h_n, c_n = self._run_recurrence(gates_x, h0_p, c0_p)
        logp_p = self._run_projection(h_all)                                # (B_p, T, V_p)

        decoder_outputs = logp_p[:B, :, :V]                                 # (B, T, V)
        decoder_hidden = (h_n[:B, :H][None, :, :], c_n[:B, :H][None, :, :])
        return decoder_outputs, decoder_hidden, None


# ---------------- pure-JAX references for verification ----------------
def _reference_forward_f32(model, encoder_outputs, encoder_hidden, target_tensor):
    """Exact f32 mirror of the PyTorch module."""
    B = encoder_outputs.shape[0]
    sos = jnp.full((B, 1), model.vocabulary.sos_token_id, dtype=jnp.int32)
    dec_in = jnp.concatenate([sos, target_tensor[:, :-1].astype(jnp.int32)], axis=1)
    x = jnp.take(model.embedding, dec_in, axis=0)
    h, c = encoder_hidden[0][0], encoder_hidden[1][0]
    H = model.hidden_size
    outs = []
    for t in range(x.shape[1]):
        xt = x[:, t, :]
        gates = xt @ model.w_ih.T + h @ model.w_hh.T + model.b_ih + model.b_hh
        i = jax.nn.sigmoid(gates[:, 0 * H:1 * H])
        f = jax.nn.sigmoid(gates[:, 1 * H:2 * H])
        g = jnp.tanh(gates[:, 2 * H:3 * H])
        o = jax.nn.sigmoid(gates[:, 3 * H:4 * H])
        c = f * c + i * g
        h = o * jnp.tanh(c)
        outs.append(jax.nn.log_softmax(h @ model.w_out.T + model.b_out, axis=-1))
    return jnp.stack(outs, axis=1), (h[None], c[None])


def _reference_forward_bf16(model, encoder_outputs, encoder_hidden, target_tensor):
    """Mirrors the kernel's mixed precision exactly (bf16 MXU inputs, f32 accumulate)."""
    bf16 = jnp.bfloat16
    B = encoder_outputs.shape[0]
    sos = jnp.full((B, 1), model.vocabulary.sos_token_id, dtype=jnp.int32)
    dec_in = jnp.concatenate([sos, target_tensor[:, :-1].astype(jnp.int32)], axis=1)
    x = jnp.take(model.embedding, dec_in, axis=0)
    wih_t = model.w_ih.T.astype(bf16)
    whh_t = model.w_hh.T.astype(bf16)
    wout_t = model.w_out.T.astype(bf16)
    bias = model.b_ih + model.b_hh
    h, c = encoder_hidden[0][0], encoder_hidden[1][0]
    H = model.hidden_size
    outs = []
    for t in range(x.shape[1]):
        xt = x[:, t, :].astype(bf16)
        gates = (jnp.dot(xt, wih_t, preferred_element_type=jnp.float32) + bias
                 + jnp.dot(h.astype(bf16), whh_t, preferred_element_type=jnp.float32))
        i = jax.nn.sigmoid(gates[:, 0 * H:1 * H])
        f = jax.nn.sigmoid(gates[:, 1 * H:2 * H])
        g = jnp.tanh(gates[:, 2 * H:3 * H])
        o = jax.nn.sigmoid(gates[:, 3 * H:4 * H])
        c = f * c + i * g
        h = o * jnp.tanh(c)
        logits = (jnp.dot(h.astype(bf16), wout_t, preferred_element_type=jnp.float32)
                  + model.b_out)
        outs.append(jax.nn.log_softmax(logits, axis=-1))
    return jnp.stack(outs, axis=1), (h[None], c[None])


if __name__ == "__main__":
    key = jax.random.PRNGKey(0)
    k_params, k_enc, k_h, k_c, k_tgt = jax.random.split(key, 5)

    B, T, H, V = 2, 8, 32, 16
    vocab = Vocabulary(size=V, sos_token_id=1)
    model = DecoderRNNPallas(hidden_size=H, vocabulary=vocab, key=k_params)

    encoder_outputs = jax.random.normal(k_enc, (B, T, H), jnp.float32)
    encoder_hidden = (
        0.1 * jax.random.normal(k_h, (1, B, H), jnp.float32),
        0.1 * jax.random.normal(k_c, (1, B, H), jnp.float32),
    )
    target_tensor = jax.random.randint(k_tgt, (B, T), 0, V, dtype=jnp.int32)

    dec_out, dec_hidden, _ = model.forward(encoder_outputs, encoder_hidden,
                                           target_tensor)
    jax.block_until_ready(dec_out)
    jax.block_until_ready(dec_hidden)

    assert dec_out.shape == (B, T, V)
    assert dec_hidden[0].shape == (1, B, H) and dec_hidden[1].shape == (1, B, H)

    # Strict check against a reference that mirrors the kernel's bf16/f32 mixed precision.
    ref_out, (ref_h, ref_c) = _reference_forward_bf16(model, encoder_outputs,
                                                      encoder_hidden, target_tensor)
    assert jnp.allclose(dec_out, ref_out, atol=5e-3, rtol=5e-3)
    assert jnp.allclose(dec_hidden[0], ref_h[None][0][None] if False else ref_h,
                        atol=5e-3, rtol=5e-3)
    assert jnp.allclose(dec_hidden[1], ref_c, atol=5e-3, rtol=5e-3)

    # Loose check against the pure-f32 PyTorch-equivalent reference (bf16 weight rounding).
    f32_out, (f32_h, f32_c) = _reference_forward_f32(model, encoder_outputs,
                                                     encoder_hidden, target_tensor)
    assert jnp.allclose(dec_out, f32_out, atol=5e-2, rtol=5e-2)
    assert jnp.allclose(dec_hidden[0], f32_h, atol=5e-2, rtol=5e-2)
    assert jnp.allclose(dec_hidden[1], f32_c, atol=5e-2, rtol=5e-2)

    print("KERNEL_OK")
</pallas_src>

<mosaic_0001>
module attributes {stable_mosaic.version = 11 : i64} {
  func.func @_lstm_recurrence_kernel(%arg0: i32, %arg1: memref<1x8x512xf32, #tpu.memory_space<vmem>>, %arg2: memref<8x128xf32, #tpu.memory_space<vmem>>, %arg3: memref<8x128xf32, #tpu.memory_space<vmem>>, %arg4: memref<128x512xbf16, #tpu.memory_space<vmem>>, %arg5: memref<1x8x128xbf16, #tpu.memory_space<vmem>>, %arg6: memref<8x128xf32, #tpu.memory_space<vmem>>, %arg7: memref<8x128xf32, #tpu.memory_space<vmem>>, %arg8: memref<8x128xf32, #tpu.memory_space<vmem>>, %arg9: memref<8x128xf32, #tpu.memory_space<vmem>>) attributes {dimension_semantics = [#tpu.dimension_semantics<arbitrary>], iteration_bounds = array<i64: 8>, scalar_prefetch = 0 : i64, scratch_operands = 2 : i64, tpu.core_type = #tpu.core_type<tc>, window_params = [{transform_indices = @transform_0, window_bounds = array<i64: 1, 8, 512>}, {pipeline_mode = #tpu.pipeline_mode<synchronous>, transform_indices = @transform_1, window_bounds = array<i64: 8, 128>}, {pipeline_mode = #tpu.pipeline_mode<synchronous>, transform_indices = @transform_2, window_bounds = array<i64: 8, 128>}, {pipeline_mode = #tpu.pipeline_mode<synchronous>, transform_indices = @transform_3, window_bounds = array<i64: 128, 512>}, {transform_indices = @transform_4, window_bounds = array<i64: 1, 8, 128>}, {pipeline_mode = #tpu.pipeline_mode<synchronous>, transform_indices = @transform_5, window_bounds = array<i64: 8, 128>}, {pipeline_mode = #tpu.pipeline_mode<synchronous>, transform_indices = @transform_6, window_bounds = array<i64: 8, 128>}]} {
    %c0_i32 = arith.constant 0 : i32
    %0 = arith.cmpi eq, %arg0, %c0_i32 : i32
    %1 = arith.extui %0 : i1 to i32
    %c0_i32_0 = arith.constant 0 : i32
    %2 = arith.cmpi ne, %1, %c0_i32_0 : i32
    scf.if %2 {
      %c0_20 = arith.constant 0 : index
      %c0_21 = arith.constant 0 : index
      %45 = vector.load %arg2[%c0_20, %c0_21] : memref<8x128xf32, #tpu.memory_space<vmem>>, vector<8x128xf32>
      %c0_22 = arith.constant 0 : index
      %c0_23 = arith.constant 0 : index
      %46 = vector.load %arg8[%c0_22, %c0_23] : memref<8x128xf32, #tpu.memory_space<vmem>>, vector<8x128xf32>
      tpu.vector_store %arg8[%c0_22, %c0_23], %45 {strides = array<i32>} : memref<8x128xf32, #tpu.memory_space<vmem>>, vector<8x128xf32>,
      %c0_24 = arith.constant 0 : index
      %c0_25 = arith.constant 0 : index
      %47 = vector.load %arg3[%c0_24, %c0_25] : memref<8x128xf32, #tpu.memory_space<vmem>>, vector<8x128xf32>
      %c0_26 = arith.constant 0 : index
      %c0_27 = arith.constant 0 : index
      %48 = vector.load %arg9[%c0_26, %c0_27] : memref<8x128xf32, #tpu.memory_space<vmem>>, vector<8x128xf32>
      tpu.vector_store %arg9[%c0_26, %c0_27], %47 {strides = array<i32>} : memref<8x128xf32, #tpu.memory_space<vmem>>, vector<8x128xf32>,
    } else {
    }
    %c0 = arith.constant 0 : index
    %c0_1 = arith.constant 0 : index
    %3 = vector.load %arg8[%c0, %c0_1] : memref<8x128xf32, #tpu.memory_space<vmem>>, vector<8x128xf32>
    %c0_2 = arith.constant 0 : index
    %c0_3 = arith.constant 0 : index
    %4 = vector.load %arg9[%c0_2, %c0_3] : memref<8x128xf32, #tpu.memory_space<vmem>>, vector<8x128xf32>
    %c0_4 = arith.constant 0 : index
    %c0_5 = arith.constant 0 : index
    %c0_6 = arith.constant 0 : index
    %5 = vector.load %arg1[%c0_4, %c0_5, %c0_6] : memref<1x8x512xf32, #tpu.memory_space<vmem>>, vector<1x8x512xf32>
    %6 = vector.shape_cast %5 : vector<1x8x512xf32> to vector<8x512xf32>
    %7 = arith.truncf %3 : vector<8x128xf32> to vector<8x128xbf16>
    %c0_7 = arith.constant 0 : index
    %c0_8 = arith.constant 0 : index
    %8 = vector.load %arg4[%c0_7, %c0_8] : memref<128x512xbf16, #tpu.memory_space<vmem>>, vector<128x512xbf16>
    %cst = arith.constant dense<0.000000e+00> : vector<8x512xf32>
    %9 = tpu.matmul %7, %8, %cst {dimension_numbers = #tpu.dot_dimension_numbers<[1], [0], [0], [1], [0, 0, 1, 1], [], []>} : vector<8x128xbf16>, vector<128x512xbf16>, vector<8x512xf32> -> vector<8x512xf32>
    %10 = arith.addf %6, %9 : vector<8x512xf32>
    %11 = vector.extract_strided_slice %10 {offsets = [0, 0], sizes = [8, 128], strides = [1, 1]} : vector<8x512xf32> to vector<8x128xf32>
    %12 = arith.negf %11 : vector<8x128xf32>
    %13 = math.exp %12 : vector<8x128xf32>
    %cst_9 = arith.constant 1.000000e+00 : f32
    %14 = vector.broadcast %cst_9 : f32 to vector<8x128xf32>
    %15 = arith.addf %14, %13 : vector<8x128xf32>
    %16 = arith.divf %14, %15 : vector<8x128xf32>
    %17 = vector.extract_strided_slice %10 {offsets = [0, 128], sizes = [8, 128], strides = [1, 1]} : vector<8x512xf32> to vector<8x128xf32>
    %18 = arith.negf %17 : vector<8x128xf32>
    %19 = math.exp %18 : vector<8x128xf32>
    %cst_10 = arith.constant 1.000000e+00 : f32
    %20 = vector.broadcast %cst_10 : f32 to vector<8x128xf32>
    %21 = arith.addf %20, %19 : vector<8x128xf32>
    %22 = arith.divf %20, %21 : vector<8x128xf32>
    %23 = vector.extract_strided_slice %10 {offsets = [0, 256], sizes = [8, 128], strides = [1, 1]} : vector<8x512xf32> to vector<8x128xf32>
    %24 = math.tanh %23 : vector<8x128xf32>
    %25 = vector.extract_strided_slice %10 {offsets = [0, 384], sizes = [8, 128], strides = [1, 1]} : vector<8x512xf32> to vector<8x128xf32>
    %26 = arith.negf %25 : vector<8x128xf32>
    %27 = math.exp %26 : vector<8x128xf32>
    %cst_11 = arith.constant 1.000000e+00 : f32
    %28 = vector.broadcast %cst_11 : f32 to vector<8x128xf32>
    %29 = arith.addf %28, %27 : vector<8x128xf32>
    %30 = arith.divf %28, %29 : vector<8x128xf32>
    %31 = arith.mulf %22, %4 : vector<8x128xf32>
    %32 = arith.mulf %16, %24 : vector<8x128xf32>
    %33 = arith.addf %31, %32 : vector<8x128xf32>
    %34 = math.tanh %33 : vector<8x128xf32>
    %35 = arith.mulf %30, %34 : vector<8x128xf32>
    %c0_12 = arith.constant 0 : index
    %c0_13 = arith.constant 0 : index
    %36 = vector.load %arg8[%c0_12, %c0_13] : memref<8x128xf32, #tpu.memory_space<vmem>>, vector<8x128xf32>
    tpu.vector_store %arg8[%c0_12, %c0_13], %35 {strides = array<i32>} : memref<8x128xf32, #tpu.memory_space<vmem>>, vector<8x128xf32>,
    %c0_14 = arith.constant 0 : index
    %c0_15 = arith.constant 0 : index
    %37 = vector.load %arg9[%c0_14, %c0_15] : memref<8x128xf32, #tpu.memory_space<vmem>>, vector<8x128xf32>
    tpu.vector_store %arg9[%c0_14, %c0_15], %33 {strides = array<i32>} : memref<8x128xf32, #tpu.memory_space<vmem>>, vector<8x128xf32>,
    %38 = arith.truncf %35 : vector<8x128xf32> to vector<8x128xbf16>
    %c0_16 = arith.constant 0 : index
    %c0_17 = arith.constant 0 : index
    %c0_18 = arith.constant 0 : index
    %39 = vector.load %arg5[%c0_16, %c0_17, %c0_18] : memref<1x8x128xbf16, #tpu.memory_space<vmem>>, vector<1x8x128xbf16>
    %40 = vector.shape_cast %39 : vector<1x8x128xbf16> to vector<8x128xbf16>
    %41 = vector.shape_cast %38 : vector<8x128xbf16> to vector<1x8x128xbf16>
    tpu.vector_store %arg5[%c0_16, %c0_17, %c0_18], %41 {strides = array<i32>} : memref<1x8x128xbf16, #tpu.memory_space<vmem>>, vector<1x8x128xbf16>,
    %c7_i32 = arith.constant 7 : i32
    %42 = arith.cmpi eq, %arg0, %c7_i32 : i32
    %43 = arith.extui %42 : i1 to i32
    %c0_i32_19 = arith.constant 0 : i32
    %44 = arith.cmpi ne, %43, %c0_i32_19 : i32
    scf.if %44 {
      %c0_20 = arith.constant 0 : index
      %c0_21 = arith.constant 0 : index
      %45 = vector.load %arg6[%c0_20, %c0_21] : memref<8x128xf32, #tpu.memory_space<vmem>>, vector<8x128xf32>
      tpu.vector_store %arg6[%c0_20, %c0_21], %35 {strides = array<i32>} : memref<8x128xf32, #tpu.memory_space<vmem>>, vector<8x128xf32>,
      %c0_22 = arith.constant 0 : index
      %c0_23 = arith.constant 0 : index
      %46 = vector.load %arg7[%c0_22, %c0_23] : memref<8x128xf32, #tpu.memory_space<vmem>>, vector<8x128xf32>
      tpu.vector_store %arg7[%c0_22, %c0_23], %33 {strides = array<i32>} : memref<8x128xf32, #tpu.memory_space<vmem>>, vector<8x128xf32>,
    } else {
    }
    return
  }
  func.func @transform_0(%arg0: i32) -> (i32, i32, i32) {
    %c0_i32 = arith.constant 0 : i32
    %c0_i32_0 = arith.constant 0 : i32
    %c0_i32_1 = arith.constant 0 : i32
    return %arg0, %c0_i32, %c0_i32_0 : i32, i32, i32
  }
  func.func @transform_1(%arg0: i32) -> (i32, i32) {
    %c0_i32 = arith.constant 0 : i32
    %c0_i32_0 = arith.constant 0 : i32
    %c0_i32_1 = arith.constant 0 : i32
    return %c0_i32, %c0_i32_0 : i32, i32
  }
  func.func @transform_2(%arg0: i32) -> (i32, i32) {
    %c0_i32 = arith.constant 0 : i32
    %c0_i32_0 = arith.constant 0 : i32
    %c0_i32_1 = arith.constant 0 : i32
    return %c0_i32, %c0_i32_0 : i32, i32
  }
  func.func @transform_3(%arg0: i32) -> (i32, i32) {
    %c0_i32 = arith.constant 0 : i32
    %c0_i32_0 = arith.constant 0 : i32
    %c0_i32_1 = arith.constant 0 : i32
    return %c0_i32, %c0_i32_0 : i32, i32
  }
  func.func @transform_4(%arg0: i32) -> (i32, i32, i32) {
    %c0_i32 = arith.constant 0 : i32
    %c0_i32_0 = arith.constant 0 : i32
    %c0_i32_1 = arith.constant 0 : i32
    return %arg0, %c0_i32, %c0_i32_0 : i32, i32, i32
  }
  func.func @transform_5(%arg0: i32) -> (i32, i32) {
    %c0_i32 = arith.constant 0 : i32
    %c0_i32_0 = arith.constant 0 : i32
    %c0_i32_1 = arith.constant 0 : i32
    return %c0_i32, %c0_i32_0 : i32, i32
  }
  func.func @transform_6(%arg0: i32) -> (i32, i32) {
    %c0_i32 = arith.constant 0 : i32
    %c0_i32_0 = arith.constant 0 : i32
    %c0_i32_1 = arith.constant 0 : i32
    return %c0_i32, %c0_i32_0 : i32, i32
  }
}

</mosaic_0001>

<bundles_post_ra>
// kernel: tpu_custom_call.1
= control target key start
LH: loop header
LB: loop body
LE: loop exit
PB: predicated region body
PF: predicated region fallthrough
CT: control target
= control target key end

     0   :  { %s1591_s0 = inlined_call_operand.hbm [shape: f32[8,8,512], index: 0, kind: input, shape index: {}]   ;;  %s1592_s1 = inlined_call_operand.hbm [shape: f32[8,128], index: 1, kind: input, shape index: {}]   ;;  %s1593_s2 = inlined_call_operand.hbm [shape: f32[8,128], index: 2, kind: input, shape index: {}]   ;;  %s1594_s3 = inlined_call_operand.hbm [shape: bf16[128,512], index: 3, kind: input, shape index: {}]   ;;  %s1595_s4 = inlined_call_operand.hbm [shape: bf16[8,8,128], index: 4, kind: output, shape index: {0}]   ;;  %s1596_s5 = inlined_call_operand.hbm [shape: f32[8,128], index: 5, kind: output, shape index: {1}]   ;;  %s1597_s6 = inlined_call_operand.hbm [shape: f32[8,128], index: 6, kind: output, shape index: {2}]  }
   0x1   :  { %1599 = sst [smem:[#allocation21_spill]] %s1591_s0 }
   0x2   :  { %12 = vsyncpa [#allocation5], 0 }
   0x3   :  { %14 = vsyncpa [#allocation5 + $0x1], 0 }
   0x4   :  { %15 = vsyncpa [#allocation8], 0 }
   0x5   :  { %16 = vsyncpa [#allocation11], 0 }
   0x6   :  { %17 = vsyncpa [#allocation6], 0 }
   0x7   :  { %19 = vsyncpa [#allocation6 + $0x1], 0 }
   0x8   :  { %20 = vsyncpa [#allocation14], 0  ;;  %s1406_s21 = smov 0   ;;  %s1408_s22 = smov 0  }
   0x9   :  { %s1410_s23 = smov 0   ;;  %s1412_s24 = smov 0  }
   0xa LB: > { %s1427_s25 = sadd.s32 4294967295, %s1362_s24   ;;  %s810_s26 = sadd.s32 4294967294, %s1362_s24   ;;  %s1362_s24 = sphi %s1412_s24, %s1615_s24   ;;  %s1358_s23 = sphi %s1410_s23, %s1614_s23   ;;  %s1354_s22 = sphi %s1408_s22, %s1613_s22   ;;  %s1350_s21 = sphi %s1406_s21, %s1612_s21  }
   0xb   : > { %p46_p0 = scmp.ne.s32.totalorder %s1354_s22, %s1350_s21  ;;  %p47_p1 = scmp.eq.s32.totalorder %s1427_s25, 0 }
   0xc   : > { %p1598_p2 = scmp.eq.s32.totalorder %s1427_s25, 7  ;;  %p139_p3 = scmp.eq.s32.totalorder %s810_s26, 7 }
   0xd   : > { %p1436_p4 = por %p47_p1, %p46_p0  ;;  %p811_p5 = scmp.ge.s32.totalorder %s1362_s24, 1 }
   0xe   : > { %p1441_p6 = por %p139_p3, %p46_p0  ;;  %p188_p7 = scmp.lt.s32.totalorder %s1362_s24, 9 }
   0xf   : > { %s200_s7 = sshll.u32 %s1592_s1, 4  ;;  %s1364_s9 = smov [#allocation7]   ;;  %s201_s7 = int_to_ptr.hbm [resolvable:$true] %s200_s7 }
  0x10   : > { %p1450_p9 = pnand %p811_p5, %p188_p7  ;;  %s202_s10 = sshll.u32 %s1364_s9, 4  ;;  %s203_s10 = int_to_ptr.vmem [resolvable:$true] %s202_s10 }
  0x11   : > { %s212_s13 = sshll.u32 %s1593_s2, 4  ;;  %s223_s17 = sshll.u32 %s1594_s3, 4  ;;  %s213_s13 = int_to_ptr.hbm [resolvable:$true] %s212_s13  ;;  %s224_s17 = int_to_ptr.hbm [resolvable:$true] %s223_s17 }
  0x12   : > { %p1023_p10 = pneg %p1450_p9  ;;  %s1365_s18 = smov [#allocation9]  }
  0x13   : > { %s214_s19 = sshll.u32 %s1365_s18, 4  ;;  %s1366_s20 = smov [#allocation10]   ;;  %s215_s19 = int_to_ptr.vmem [resolvable:$true] %s214_s19 }
  0x14   : > { %p1461_p11 = pnand %p1023_p10, %p47_p1  ;;  %s225_s26 = sshll.u32 %s1366_s20, 4  ;;  %s226_s26 = int_to_ptr.vmem [resolvable:$true] %s225_s26 }
  0x15   : > { %s1367_s29 = smov 256   ;;  %s1368_s30 = smov 16  }
  0x16   : > { %1026 = dma.hbm_to_vmem [thread:$0]  (!%p1461_p11), %s201_s7, 128, %s203_s10, [#allocation8]  }
  0x17   : > { %1029 = dma.hbm_to_vmem [thread:$0]  (!%p1461_p11), %s213_s13, 128, %s215_s19, [#allocation8]  }
  0x18   : > { %1032 = dma.hbm_to_vmem [thread:$0]  (!%p1461_p11), %s224_s17, 4096, %s226_s26, [#allocation11], %s1367_s29, %s1367_s29, %s1368_s30  }
  0x19   : > { %s1475_s9 = sadd.s32 1, %s1362_s24   ;;  %s33_s10 = sadd.s32 1, %s1358_s23 }
  0x1a   : > { %s30_s7 = ssub.s32 %s1362_s24, %s1475_s9  ;;  %p40_p13 = scmp.ne.s32.totalorder %s1358_s23, %s1354_s22 }
  0x1b   : > { %p31_p12 = scmp.eq.s32.totalorder %s30_s7, 0  ;;  %p41_p0 = scmp.eq.s32.totalorder %s1362_s24, 0 }
  0x1c   : > { %p1488_p3 = por %p1598_p2, %p40_p13  ;;  %p1044_p5 = scmp.lt.s32.totalorder %s1362_s24, 8 }
  0x1d   : > { %s1484_s11 = scalar_select %p31_p12, %s1358_s23, %s33_s10  }
  0x1e   : > { %s239_s13 = sand.u32 1, %s1358_s23   ;;  %s966_s15 = sshll.u32 %s1362_s24, 5 }
  0x1f   : > { %p42_p7 = por %p41_p0, %p40_p13  ;;  %s816_s14 = sshll.u32 %s239_s13, 5 }
  0x20   : > { %s1605_s0 = sld [smem:[#allocation21_spill]]  ;;  %s243_s20 = scalar_lea.vmem [#allocation4], %s816_s14 }
  0x21   : > { %s252_s26 = sshll.u32 %s243_s20, 4  ;;  %p1498_p10 = pnand %p1044_p5, %p42_p7  ;;  %s253_s26 = int_to_ptr.vmem [resolvable:$true] %s252_s26 }
  0x22   : > { %s240_s30 = scalar_lea.sflag [#allocation5], %s239_s13 }
  0x23   : > { %p1202_p12 = pneg %p1498_p10 }
  0x26   : > { %s248_s18 = scalar_lea.hbm %s1605_s0, %s966_s15  ;;  %s1205_s14 = scalar_lea.hbm %s1605_s0, 256 }
  0x27   : > { %s250_s19 = sshll.u32 %s248_s18, 4  ;;  %s251_s19 = int_to_ptr.hbm [resolvable:$true] %s250_s19 }
  0x28   : > { %s1198_s7 = sshra.s32 %s251_s19, 4  ;;  %s1199_s7 = int_to_ptr.hbm [resolvable:$true] %s1198_s7 }
  0x29   : > { %s1200_s10 = scalar_lea.hbm %s1199_s7, 32  ;;  %p1206_p5 = scmp.lt.s32.totalorder %s1199_s7, %s1605_s0 }
  0x2a   : > { %p1201_p11 = scmp.ne.s32.totalorder %s1199_s7, %s1200_s10  ;;  %p1207_p7 = scmp.lt.s32.totalorder %s1205_s14, %s1200_s10 }
  0x2c   : > { %p1203_p13 = pnand %p1202_p12, %p1201_p11  ;;  %p1208_p2 = por %p1207_p7, %p1206_p5 }
  0x2e   : > { %p1204_p0 = pneg %p1203_p13 }
  0x30   : > { %p1209_p8 = pnand %p1208_p2, %p1204_p0 }
  0x32   : > { %1212 = shalt.err (!%p1209_p8)
}
  0x33   : > { %1036 = dma.hbm_to_vmem [thread:$0]  (!%p1498_p10), %s251_s19, 512, %s253_s26, %s240_s30  }
  0x34   : > { %261 = sbr.rel (%p1450_p9) target bundleno = 305 (0x131), region = 36  ;;  %s1515_s13 = sand.u32 (!%p1450_p9), 1, %s1354_s22  }
  0x35   : > { %s820_s20 = sshll.u32 (!%p1450_p9), %s1515_s13, 5  ;;  %s264_s15 = scalar_lea.sflag (!%p1450_p9), [#allocation5], %s1515_s13 }
  0x36   : > { %s1519_s16 = scalar_lea.vmem (!%p1450_p9), [#allocation4], %s820_s20 }
  0x39   : > { %1329 = dma.done.wait (%p1436_p4), %s264_s15, 512  }
  0x3a   : > { %1331 = vsyncadd (%p1436_p4), %s264_s15, 4294966784 }
  0x3b   : > { %1333 = dma.done.wait (%p47_p1), [#allocation8], 256  }
  0x3c   : > { %1335 = vsyncadd (%p47_p1), [#allocation8], 4294967040 }
  0x3d   : > { %1337 = dma.done.wait (%p47_p1), [#allocation11], 4096  }
  0x3e   : > { %1339 = vsyncadd (%p47_p1), [#allocation11], 4294963200  ;;  %s824_s8 = sshll.u32 %s1515_s13, 2  ;;  %p1607_p2 = scmp.ne.s32.totalorder %s1427_s25, 0 }
  0x3f   : > { %s1534_s19 = scalar_lea.vmem [#allocation12], %s824_s8 }
  0x40   : > { %315 = sbr.rel (%p1607_p2) target bundleno = 72 (0x48), region = 56 }
  0x45   : > { %v316_v0 = vld [vmem:[#allocation7] sm:$0xff]  ;;  %v318_v1 = vld [vmem:[#allocation9] sm:$0xff] }
  0x46   : > { %317 = vst [vmem:[#allocation2] sm:$0xff] %v316_v0 }
  0x47   : > { %319 = vst [vmem:[#allocation3] sm:$0xff] %v318_v1 }
  0x48 PF: > { %v940_v2 = vld [vmem:[#allocation10 + $0xe0] sm:$0xf]  ;;  %v997_v3 = vld [vmem:[#allocation10 + $0xec] sm:$0xf0]  ;;  %v995_v4 = vld [vmem:[#allocation10 + $0xe4] sm:$0xf] }
  0x49   : > { %v941_v5 = vor.u32 %v997_v3, %v940_v2  ;;  %v942_v6 = vld [vmem:[#allocation10 + $0xf0] sm:$0xf0]  ;;  %v996_v7 = vld [vmem:[#allocation10 + $0xec] sm:$0xf]  ;;  %v950_v8 = vld [vmem:[#allocation10 + $0xf8] sm:$0xf0] }
  0x4a   : > { %v945_v9 = vor.u32 %v995_v4, %v942_v6  ;;  %v953_v10 = vor.u32 %v996_v7, %v950_v8  ;;  %v924_v11 = vld [vmem:[#allocation10 + $0xc0] sm:$0xf]  ;;  %v993_v12 = vld [vmem:[#allocation10 + $0xcc] sm:$0xf0]  ;;  %v991_v13 = vld [vmem:[#allocation10 + $0xc4] sm:$0xf] }
  0x4b   : > { %519 = vmatpush.bf16.msra.mxu0 %v941_v5  ;;  %v925_v14 = vor.u32 %v993_v12, %v924_v11  ;;  %v926_v15 = vld [vmem:[#allocation10 + $0xd0] sm:$0xf0]  ;;  %v992_v16 = vld [vmem:[#allocation10 + $0xcc] sm:$0xf]  ;;  %v934_v17 = vld [vmem:[#allocation10 + $0xd8] sm:$0xf0] }
  0x4c   : > { %532 = vmatpush.bf16.msra.mxu1 %v945_v9  ;;  %558 = vmatpush.bf16.msra.mxu3 %v953_v10  ;;  %v929_v18 = vor.u32 %v991_v13, %v926_v15  ;;  %v937_v19 = vor.u32 %v992_v16, %v934_v17  ;;  %v948_v20 = vld [vmem:[#allocation10 + $0xe8] sm:$0xf]  ;;  %v998_v21 = vld [vmem:[#allocation10 + $0xf4] sm:$0xf0]  ;;  %v908_v22 = vld [vmem:[#allocation10 + $0xa0] sm:$0xf] }
  0x4d   : > { %v949_v23 = vor.u32 %v998_v21, %v948_v20  ;;  %v989_v24 = vld [vmem:[#allocation10 + $0xac] sm:$0xf0]  ;;  %v987_v25 = vld [vmem:[#allocation10 + $0xa4] sm:$0xf]  ;;  %v910_v26 = vld [vmem:[#allocation10 + $0xb0] sm:$0xf0] }
  0x4e   : > { %v988_v27 = vld [vmem:[#allocation10 + $0xac] sm:$0xf]  ;;  %v918_v28 = vld [vmem:[#allocation10 + $0xb8] sm:$0xf0]  ;;  %v932_v29 = vld [vmem:[#allocation10 + $0xc8] sm:$0xf]  ;;  %v909_v30 = vor.u32 %v989_v24, %v908_v22  ;;  %v913_v34 = vor.u32 %v987_v25, %v910_v26 }
  0x4f   : > { %520 = vmatpush.bf16.msra.mxu0 %v925_v14  ;;  %545 = vmatpush.bf16.msra.mxu2 %v949_v23  ;;  %v994_v31 = vld [vmem:[#allocation10 + $0xd4] sm:$0xf0]  ;;  %v892_v32 = vld [vmem:[#allocation10 + $0x80] sm:$0xf]  ;;  %v985_v33 = vld [vmem:[#allocation10 + $0x8c] sm:$0xf0]  ;;  %v921_v35 = vor.u32 %v988_v27, %v918_v28 }
  0x50   : > { %533 = vmatpush.bf16.msra.mxu1 %v929_v18  ;;  %559 = vmatpush.bf16.msra.mxu3 %v937_v19  ;;  %v933_v36 = vor.u32 %v994_v31, %v932_v29  ;;  %v983_v37 = vld [vmem:[#allocation10 + $0x84] sm:$0xf]  ;;  %v894_v38 = vld [vmem:[#allocation10 + $0x90] sm:$0xf0]  ;;  %v984_v39 = vld [vmem:[#allocation10 + $0x8c] sm:$0xf]  ;;  %v893_v43 = vor.u32 %v985_v33, %v892_v32 }
  0x51   : > { %v902_v40 = vld [vmem:[#allocation10 + $0x98] sm:$0xf0]  ;;  %v916_v41 = vld [vmem:[#allocation10 + $0xa8] sm:$0xf]  ;;  %v990_v42 = vld [vmem:[#allocation10 + $0xb4] sm:$0xf0]  ;;  %v897_v47 = vor.u32 %v983_v37, %v894_v38 }
  0x52   : > { %v917_v44 = vor.u32 %v990_v42, %v916_v41  ;;  %v876_v45 = vld [vmem:[#allocation10 + $0x60] sm:$0xf]  ;;  %v981_v46 = vld [vmem:[#allocation10 + $0x6c] sm:$0xf0]  ;;  %v905_v48 = vor.u32 %v984_v39, %v902_v40  ;;  %v979_v49 = vld [vmem:[#allocation10 + $0x64] sm:$0xf] }
  0x53   : > { %521 = vmatpush.bf16.msra.mxu0 %v909_v30  ;;  %546 = vmatpush.bf16.msra.mxu2 %v933_v36  ;;  %v900_v50 = vld [vmem:[#allocation10 + $0x88] sm:$0xf]  ;;  %v986_v51 = vld [vmem:[#allocation10 + $0x94] sm:$0xf0]  ;;  %v878_v52 = vld [vmem:[#allocation10 + $0x70] sm:$0xf0]  ;;  %v877_v55 = vor.u32 %v981_v46, %v876_v45 }
  0x54   : > { %534 = vmatpush.bf16.msra.mxu1 %v913_v34  ;;  %560 = vmatpush.bf16.msra.mxu3 %v921_v35  ;;  %v980_v53 = vld [vmem:[#allocation10 + $0x6c] sm:$0xf]  ;;  %v886_v54 = vld [vmem:[#allocation10 + $0x78] sm:$0xf0]  ;;  %v901_v56 = vor.u32 %v986_v51, %v900_v50  ;;  %v860_v57 = vld [vmem:[#allocation10 + $0x40] sm:$0xf]  ;;  %v881_v59 = vor.u32 %v979_v49, %v878_v52 }
  0x55   : > { %v977_v58 = vld [vmem:[#allocation10 + $0x4c] sm:$0xf0]  ;;  %v889_v60 = vor.u32 %v980_v53, %v886_v54  ;;  %v975_v61 = vld [vmem:[#allocation10 + $0x44] sm:$0xf]  ;;  %v884_v62 = vld [vmem:[#allocation10 + $0x68] sm:$0xf] }
  0x56   : > { %v982_v63 = vld [vmem:[#allocation10 + $0x74] sm:$0xf0]  ;;  %v862_v0 = vld [vmem:[#allocation10 + $0x50] sm:$0xf0]  ;;  %v976_v1 = vld [vmem:[#allocation10 + $0x4c] sm:$0xf]  ;;  %v861_v3 = vor.u32 %v977_v58, %v860_v57 }
  0x57   : > { %522 = vmatpush.bf16.msra.mxu0 %v893_v43  ;;  %547 = vmatpush.bf16.msra.mxu2 %v917_v44  ;;  %v870_v2 = vld [vmem:[#allocation10 + $0x58] sm:$0xf0]  ;;  %v885_v4 = vor.u32 %v982_v63, %v884_v62  ;;  %v844_v5 = vld [vmem:[#allocation10 + $0x20] sm:$0xf]  ;;  %v973_v6 = vld [vmem:[#allocation10 + $0x2c] sm:$0xf0]  ;;  %v865_v7 = vor.u32 %v975_v61, %v862_v0 }
  0x58   : > { %535 = vmatpush.bf16.msra.mxu1 %v897_v47  ;;  %561 = vmatpush.bf16.msra.mxu3 %v905_v48  ;;  %v873_v8 = vor.u32 %v976_v1, %v870_v2  ;;  %v971_v9 = vld [vmem:[#allocation10 + $0x24] sm:$0xf]  ;;  %v868_v10 = vld [vmem:[#allocation10 + $0x48] sm:$0xf]  ;;  %v978_v11 = vld [vmem:[#allocation10 + $0x54] sm:$0xf0]  ;;  %v845_v15 = vor.u32 %v973_v6, %v844_v5 }
  0x59   : > { %v846_v12 = vld [vmem:[#allocation10 + $0x30] sm:$0xf0]  ;;  %v972_v13 = vld [vmem:[#allocation10 + $0x2c] sm:$0xf]  ;;  %v854_v14 = vld [vmem:[#allocation10 + $0x38] sm:$0xf0]  ;;  %v869_v16 = vor.u32 %v978_v11, %v868_v10 }
  0x5a   : > { %v828_v17 = vld [vmem:[#allocation10] sm:$0xf]  ;;  %v969_v18 = vld [vmem:[#allocation10 + $0xc] sm:$0xf0]  ;;  %v849_v19 = vor.u32 %v971_v9, %v846_v12  ;;  %v857_v20 = vor.u32 %v972_v13, %v854_v14  ;;  %v967_v21 = vld [vmem:[#allocation10 + $0x4] sm:$0xf] }
  0x5b   : > { %523 = vmatpush.bf16.msra.mxu0 %v877_v55  ;;  %548 = vmatpush.bf16.msra.mxu2 %v901_v56  ;;  %v852_v22 = vld [vmem:[#allocation10 + $0x28] sm:$0xf]  ;;  %v974_v23 = vld [vmem:[#allocation10 + $0x34] sm:$0xf0]  ;;  %v830_v24 = vld [vmem:[#allocation10 + $0x10] sm:$0xf0]  ;;  %v829_v27 = vor.u32 %v969_v18, %v828_v17 }
  0x5c   : > { %536 = vmatpush.bf16.msra.mxu1 %v881_v59  ;;  %562 = vmatpush.bf16.msra.mxu3 %v889_v60  ;;  %v968_v25 = vld [vmem:[#allocation10 + $0xc] sm:$0xf]  ;;  %v838_v26 = vld [vmem:[#allocation10 + $0x18] sm:$0xf0]  ;;  %v320_v28 = vld [vmem:[#allocation2] sm:$0xff]  ;;  %v853_v29 = vor.u32 %v974_v23, %v852_v22  ;;  %v833_v30 = vor.u32 %v967_v21, %v830_v24  ;;  %p957_p1 = scmp.ne.s32.totalorder %s1427_s25, 7 }
  0x5d   : > { %v841_v31 = vor.u32 %v968_v25, %v838_v26  ;;  %v836_v32 = vld [vmem:[#allocation10 + $0x8] sm:$0xf]  ;;  %v970_v33 = vld [vmem:[#allocation10 + $0x14] sm:$0xf0]  ;;  %v326_v34 = vpack.c.bf16 %v320_v28, %v320_v28  ;;  %v322_v36 = vld [vmem:[%s1519_s16] sm:$0xff] }
  0x5e   : > { %v837_v35 = vor.u32 %v970_v33, %v836_v32  ;;  %v323_v37 = vld [vmem:[%s1519_s16 + $0x8] sm:$0xff]  ;;  %v325_v44 = vld [vmem:[%s1519_s16 + $0x18] sm:$0xff]  ;;  %v324_v55 = vld [vmem:[%s1519_s16 + $0x10] sm:$0xff] }
  0x5f   : > { %524 = vmatpush.bf16.msra.mxu0 %v861_v3  ;;  %549 = vmatpush.bf16.msra.mxu2 %v885_v4 }
  0x60   : > { %537 = vmatpush.bf16.msra.mxu1 %v865_v7  ;;  %563 = vmatpush.bf16.msra.mxu3 %v873_v8 }
  0x63   : > { %525 = vmatpush.bf16.msra.mxu0 %v845_v15  ;;  %550 = vmatpush.bf16.msra.mxu2 %v869_v16  ;;  %v321_v16 = vld [vmem:[#allocation3] sm:$0xff] }
  0x64   : > { %538 = vmatpush.bf16.msra.mxu1 %v849_v19  ;;  %564 = vmatpush.bf16.msra.mxu3 %v857_v20 }
  0x67   : > { %526 = vmatpush.bf16.msra.mxu0 %v829_v27  ;;  %551 = vmatpush.bf16.msra.mxu2 %v853_v29 }
  0x68   : > { %539 = vmatpush.bf16.msra.mxu1 %v833_v30  ;;  %565 = vmatpush.bf16.msra.mxu3 %v841_v31 }
  0x6a   : > { %527 = vmatmul.bf16.vlgmr.msra.gmra.mxu0 %v326_v34 }
  0x6b   : > { %540 = vmatmul.bf16.vlgmr.msra.gmra.mxu1 %v326_v34  ;;  %566 = vmatmul.bf16.vlgmr.msra.gmra.mxu3 %v326_v34 }
  0x6c   : > { %552 = vmatpush.bf16.msra.mxu2 %v837_v35 }
  0x6f   : > { %553 = vmatmul.bf16.vlgmr.msra.gmra.mxu2 %v326_v34 }
  0xe7   : > { %v528_v38 = vpop.f32.mrf.mxu0 }
  0xe8   : > { %v571_v39 = vadd.f32 %v528_v38, %v322_v36  ;;  %v541_v40 = vpop.f32.mrf.mxu1 }
  0xe9   : > { %v572_v41 = vadd.f32 %v541_v40, %v323_v37 }
  0xea   : > { %v954_v42 = vmul.f32 -1.442695, %v571_v39 }
  0xeb   : > { %v955_v43 = vmul.f32 -1.442695, %v572_v41 }
  0xec   : > { %1092 = vpow2.f32 %v954_v42 }
  0xed   : > { %1094 = vpow2.f32 %v955_v43 }
  0xee   : > { %v567_v45 = vpop.f32.mrf.mxu3 }
  0xef   : > { %v574_v46 = vadd.f32 %v567_v45, %v325_v44  ;;  %v530_v47 = vpop.f32.mrf.mxu0 }
  0xf0   : > { %v543_v48 = vpop.f32.mrf.mxu1 }
  0xf1   : > { %v956_v49 = vmul.f32 -1.442695, %v574_v46 }
  0xf2   : > { %v1093_v50 = vpop.eup %1092  ;;  %v554_v51 = vpop.f32.mrf.mxu2 }
  0xf3   : > { %v1095_v52 = vpop.eup %1094  ;;  %v578_v53 = vadd.f32 1.0, %v1093_v50  ;;  %1096 = vpow2.f32 %v956_v49  ;;  %v573_v58 = vadd.f32 %v554_v51, %v324_v55 }
  0xf4   : > { %v597_v54 = vadd.f32 1.0, %v1095_v52 }
  0xf5   : > { %1098 = vrcp.f32 %v578_v53  ;;  %v590_v3 = vand.u32 2147483648, %v578_v53  ;;  %v588_v6 = vand.u32 2147483647, %v578_v53  ;;  %vm584_vm2 = vweird.f32 %v578_v53 }
  0xf6   : > { %1100 = vrcp.f32 %v597_v54  ;;  %v569_v56 = vpop.f32.mrf.mxu3  ;;  %v609_v4 = vand.u32 2147483648, %v597_v54  ;;  %v607_v8 = vand.u32 2147483647, %v597_v54  ;;  %vm603_vm3 = vweird.f32 %v597_v54 }
  0xf7   : > { %v591_v13 = vor.u32 1.1754944e-38, %v590_v3  ;;  %vm589_vm6 = vcmp.eq.f32.partialorder %v588_v6, 8.507059e+37 }
  0xf8   : > { %v610_v15 = vor.u32 1.1754944e-38, %v609_v4  ;;  %vm608_vm7 = vcmp.eq.f32.partialorder %v607_v8, 8.507059e+37 }
  0xf9   : > { %v1097_v57 = vpop.eup %1096 }
  0xfa   : > { %v617_v59 = vadd.f32 1.0, %v1097_v57  ;;  %v556_v60 = vpop.f32.mrf.mxu2 }
  0xfb   : > { %v1099_v61 = vpop.eup %1098 }
  0xfc   : > { %v1101_v62 = vpop.eup %1100  ;;  %v580_v63 = vmul.f32 %v1099_v61, %v578_v53  ;;  %1102 = vrcp.f32 %v617_v59  ;;  %vm585_vm0 = vweird.f32 %v1099_v61  ;;  %v629_v27 = vand.u32 2147483648, %v617_v59 }
  0xfd   : > { %v599_v0 = vmul.f32 %v1101_v62, %v597_v54  ;;  %1104 = vtanh.f32 %v573_v58  ;;  %vm604_vm1 = vweird.f32 %v1101_v62  ;;  %vm586_vm4 = vmor %vm584_vm2, %vm585_vm0  ;;  %vm623_vm9 = vweird.f32 %v617_v59 }
  0xfe   : > { %v581_v1 = vsub.f32 1.0, %v580_v63  ;;  %vm605_vm5 = vmor %vm603_vm3, %vm604_vm1  ;;  %v627_v28 = vand.u32 2147483647, %v617_v59  ;;  %v630_v30 = vor.u32 1.1754944e-38, %v629_v27 }
  0xff   : > { %v600_v2 = vsub.f32 1.0, %v599_v0 }
 0x100   : > { %v582_v5 = vmul.f32 %v1099_v61, %v581_v1  ;;  %vm628_vm11 = vcmp.eq.f32.partialorder %v627_v28, 8.507059e+37 }
 0x101   : > { %v601_v7 = vmul.f32 %v1101_v62, %v600_v2 }
 0x102   : > { %v1103_v9 = vpop.eup %1102  ;;  %v583_v10 = vadd.f32 %v1099_v61, %v582_v5 }
 0x103   : > { %v1105_v11 = vpop.eup %1104  ;;  %v619_v12 = vmul.f32 %v1103_v9, %v617_v59  ;;  %v602_v14 = vadd.f32 %v1101_v62, %v601_v7  ;;  %vm624_vm8 = vweird.f32 %v1103_v9 }
 0x104   : > { %v587_v17 = vsel %vm586_vm4, %v1099_v61, %v583_v10  ;;  %vm625_vm10 = vmor %vm623_vm9, %vm624_vm8 }
 0x105   : > { %v620_v18 = vsub.f32 1.0, %v619_v12  ;;  %v592_v19 = vsel %vm589_vm6, %v591_v13, %v587_v17  ;;  %v606_v20 = vsel %vm605_vm5, %v1101_v62, %v602_v14 }
 0x106   : > { %v611_v21 = vsel %vm608_vm7, %v610_v15, %v606_v20  ;;  %v634_v22 = vmul.f32 %v1105_v11, %v592_v19 }
 0x107   : > { %v621_v23 = vmul.f32 %v1103_v9, %v620_v18  ;;  %v633_v24 = vmul.f32 %v611_v21, %v321_v16 }
 0x109   : > { %v635_v25 = vadd.f32 %v634_v22, %v633_v24  ;;  %v622_v26 = vadd.f32 %v1103_v9, %v621_v23 }
 0x10b   : > { %1106 = vtanh.f32 %v635_v25  ;;  %639 = vst [vmem:[#allocation3] sm:$0xff] %v635_v25  ;;  %v626_v29 = vsel %vm625_vm10, %v1103_v9, %v622_v26 }
 0x10c   : > { %v631_v32 = vsel %vm628_vm11, %v630_v30, %v626_v29 }
 0x111   : > { %v1107_v31 = vpop.eup %1106 }
 0x112   : > { %v637_v33 = vmul.f32 %v1107_v31, %v631_v32  ;;  %645 = sbr.rel (%p957_p1) target bundleno = 281 (0x119), region = 60 }
 0x114   : > { %638 = vst [vmem:[#allocation2] sm:$0xff] %v637_v33  ;;  %v640_v34 = vpack.c.bf16 %v637_v33, %v637_v33 }
 0x116   : > { %641 = vst [vmem:[%s1534_s19] sm:$0xf] %v640_v34 }
 0x117   : > { %646 = vst [vmem:[#allocation13] sm:$0xff] %v637_v33 }
 0x118   : > { %647 = vst [vmem:[#allocation15] sm:$0xff] %v635_v25 }
 0x119 PF: > { %s675_s29 = sshll.u32 %s1596_s5, 4  ;;  %s1369_s30 = smov [#allocation13]   ;;  %s676_s29 = int_to_ptr.hbm [resolvable:$true] %s675_s29 }
 0x11a   : > { %s673_s7 = sshll.u32 %s1369_s30, 4  ;;  %p1608_p4 = scmp.eq.s32.totalorder %s1427_s25, 7  ;;  %s674_s7 = int_to_ptr.vmem [resolvable:$true] %s673_s7 }
 0x11b   : > { %s959_s10 = sshll.u32 %s1427_s25, 2  ;;  %s661_s14 = sshll.u32 %s1534_s19, 4  ;;  %s662_s14 = int_to_ptr.vmem [resolvable:$true] %s661_s14 }
 0x11c   : > { %1015 = dma.vmem_to_hbm [thread:$0]  (%p1608_p4), %s674_s7, 128, %s676_s29, [#allocation14]  }
 0x11d   : > { %s659_s20 = scalar_lea.hbm %s1595_s4, %s959_s10  ;;  %s1370_s16 = smov [#allocation15]  }
 0x11e   : > { %s663_s15 = sshll.u32 %s659_s20, 4  ;;  %s685_s8 = sshll.u32 %s1370_s16, 4  ;;  %s664_s15 = int_to_ptr.hbm [resolvable:$true] %s663_s15  ;;  %s686_s8 = int_to_ptr.vmem [resolvable:$true] %s685_s8 }
 0x11f   : > { %s649_s27 = scalar_lea.sflag [#allocation6], %s1515_s13  ;;  %s1270_s26 = sshra.s32 %s664_s15, 4  ;;  %s1271_s26 = int_to_ptr.hbm [resolvable:$true] %s1270_s26 }
 0x120   : > { %s1272_s30 = scalar_lea.hbm %s1271_s26, 4  ;;  %s1276_s19 = scalar_lea.hbm %s1595_s4, 32 }
 0x121   : > { %p1273_p8 = scmp.ne.s32.totalorder %s1271_s26, %s1272_s30  ;;  %p1277_p11 = scmp.lt.s32.totalorder %s1271_s26, %s1595_s4 }
 0x122   : > { %p1278_p12 = scmp.lt.s32.totalorder %s1276_s19, %s1272_s30 }
 0x123   : > { %p1274_p9 = pnand %p1273_p8, %p1488_p3 }
 0x124   : > { %p1279_p13 = por %p1278_p12, %p1277_p11 }
 0x125   : > { %p1275_p10 = pneg %p1274_p9 }
 0x127   : > { %p1280_p0 = pnand %p1279_p13, %p1275_p10 }
 0x129   : > { %1283 = shalt.err (!%p1280_p0)
}
 0x12a   : > { %1013 = dma.vmem_to_hbm [thread:$0]  (%p1488_p3), %s662_s14, 64, %s664_s15, %s649_s27  }
 0x12b   : > { %s687_s18 = sshll.u32 %s1597_s6, 4  ;;  %p1609_p5 = pmov %p1608_p4  ;;  %s688_s18 = int_to_ptr.hbm [resolvable:$true] %s687_s18 }
 0x12c   : > { %p1610_p7 = pmov %p1608_p4 }
 0x12d   : > { %1017 = dma.vmem_to_hbm [thread:$0]  (%p1609_p5), %s686_s8, 128, %s688_s18, [#allocation14]  }
 0x12e   : > { %1341 = dma.done.wait (%p1610_p7), [#allocation14], 256   ;;  %p1611_p2 = pmov %p1608_p4 }
 0x130   : > { %1343 = vsyncadd (%p1611_p2), [#allocation14], 4294967040 }
 0x131 PF: > { %p1052_p1 = scmp.ge.s32.totalorder %s1362_s24, 2  ;;  %s709_s0 = sand.u32 1, %s1350_s21  }
 0x132   : > { %s710_s12 = scalar_lea.sflag [#allocation6], %s709_s0 }
 0x133   : > { %p1038_p3 = pnand %p1052_p1, %p1441_p6 }
 0x135   : > { %p1039_p4 = pneg %p1038_p3 }
 0x137   : > { %1345 = dma.done.wait (%p1039_p4), %s710_s12, 64  }
 0x138   : > { %1347 = vsyncadd (%p1039_p4), %s710_s12, 4294967232  ;;  %p23_p8 = scmp.ge.s32.totalorder %s1475_s9, 10   ;;  %s1612_s21 = smov %s1354_s22 }
 0x139   : > { %s1613_s22 = smov %s1358_s23  ;;  %s1614_s23 = smov %s1484_s11 }
 0x13a   : > { %s1615_s24 = smov %s1475_s9  ;;  %25 = sbr.rel (!%p23_p8) target bundleno = 10 (0xa), region = 117 }
 0x13f   :  { %716 = vsyncpa [#allocation5], 1 }
 0x140   :  { %718 = vsyncpa [#allocation5 + $0x1], 1 }
 0x141   :  { %719 = vsyncpa [#allocation8], 1 }
 0x142   :  { %720 = vsyncpa [#allocation11], 1 }
 0x143   :  { %721 = vsyncpa [#allocation6], 1 }
 0x144   :  { %723 = vsyncpa [#allocation6 + $0x1], 1 }
 0x145   :  { %724 = vsyncpa [#allocation14], 1 }

</bundles_post_ra>
